<compile_context>
chip_gen: v6e
topology: v6e:2x2x1
jax: 0.10.0
libtpu: 0.0.40
codegen_flags: <defaults>
</compile_context>

<pallas_src>
import functools

import jax
import jax.numpy as jnp
from jax.experimental import pallas as pl
from jax.experimental.pallas import tpu as pltpu

IN_FEATURES = 10
OUT_FEATURES = 5
SUBLANE = 8
MAX_BATCH_TILE = 4096      # (tb,10) f32 in-tile + (tb,5) out-tile double-buffered ~< 1 MiB
MIN_TWO_STEP_BATCH = 1024  # v7x: >=2 grid steps lets "parallel" shard across both TCs


def _round_up(n, m):
    return ((n + m - 1) // m) * m


def linear_kernel(x_ref, w_ref, b_ref, o_ref):
    # x_ref: (tb, 10)  w_ref: (10, 5)  b_ref: (1, 5)  o_ref: (tb, 5)
    # Contract directly over K=10 on the MXU, accumulate in f32, add bias on the VPU.
    y = jnp.dot(x_ref[...], w_ref[...], preferred_element_type=jnp.float32)
    o_ref[...] = (y + b_ref[...]).astype(o_ref.dtype)


def prepare_params(weight, bias):
    """One-time parameter plumbing: pre-transpose weight to (in, out), bias to (1, out).

    No lane padding anywhere: full-dim blocks are legal and keeping x / out narrow avoids
    12-25x HBM byte amplification on this tiny-K, tiny-N linear.
    """
    out_f, in_f = weight.shape
    assert bias.shape == (out_f,), "bias / weight shape mismatch"
    w_t = jnp.asarray(weight, jnp.float32).T            # (in_f, out_f)
    b2 = jnp.asarray(bias, jnp.float32).reshape(1, out_f)
    return w_t, b2


@functools.partial(jax.jit, static_argnames=("small_batch_xla_threshold",))
def linear_forward(x, w_t, b2, *, small_batch_xla_threshold=0):
    B, in_f = x.shape
    in_w, out_f = w_t.shape
    assert in_f == in_w, "x / prepared weight feature mismatch"
    assert b2.shape == (1, out_f), "prepared bias / prepared weight mismatch"

    # Optional tiny-batch fast path: at a few rows, launch + grid-step overhead dominates
    # and XLA's fused dot wins. Default 0 so the Pallas path below is always exercised.
    if B <= small_batch_xla_threshold:
        return (x.astype(jnp.float32) @ w_t + b2[0]).astype(x.dtype)

    # Balanced batch tiles: minimise batch padding, cap tile size, and force >= 2 grid
    # steps on large batches so both v7x TensorCores are used.
    num_tiles = pl.cdiv(B, MAX_BATCH_TILE)
    if num_tiles == 1 and B >= MIN_TWO_STEP_BATCH:
        num_tiles = 2
    tb = _round_up(pl.cdiv(B, num_tiles), SUBLANE)
    num_tiles = pl.cdiv(B, tb)
    b_padded = tb * num_tiles

    # Only batch-row padding (if any); no lane padding of x.
    x_p = x if b_padded == B else jnp.pad(x, ((0, b_padded - B), (0, 0)))

    out_padded = pl.pallas_call(
        linear_kernel,
        out_shape=jax.ShapeDtypeStruct((b_padded, out_f), x.dtype),
        grid=(num_tiles,),
        in_specs=[
            pl.BlockSpec((tb, in_f), lambda i: (i, 0)),     # x: tiled over batch, unpadded lanes
            pl.BlockSpec((in_f, out_f), lambda i: (0, 0)),  # weight: VMEM-resident full block
            pl.BlockSpec((1, out_f), lambda i: (0, 0)),     # bias: VMEM-resident full block
        ],
        out_specs=pl.BlockSpec((tb, out_f), lambda i: (i, 0)),
        compiler_params=pltpu.CompilerParams(
            dimension_semantics=("parallel",),
        ),
    )(x_p, w_t, b2)

    # Note: padded rows (>= B) contain the bias, not zeros; they are sliced off here.
    return out_padded if b_padded == B else out_padded[:B]


def init_params():
    # Deterministic init mimicking nn.Linear(10, 5) parameter shapes.
    kw, kb = jax.random.split(jax.random.PRNGKey(42))
    bound = 1.0 / (float(IN_FEATURES) ** 0.5)
    weight = jax.random.uniform(kw, (OUT_FEATURES, IN_FEATURES), jnp.float32, -bound, bound)
    bias = jax.random.uniform(kb, (OUT_FEATURES,), jnp.float32, -bound, bound)
    return weight, bias


if __name__ == "__main__":
    weight, bias = init_params()
    # Parameter plumbing hoisted out of the per-call path (done once).
    w_t, b2 = prepare_params(weight, bias)

    x = jax.random.normal(jax.random.PRNGKey(0), (8, IN_FEATURES), dtype=jnp.float32)

    out = linear_forward(x, w_t, b2)
    out = jax.block_until_ready(out)

    # Reference check in plain JAX (same math as torch.nn.Linear).
    ref = x @ weight.T + bias
    assert out.shape == (8, OUT_FEATURES)
    assert jnp.allclose(out, ref, atol=1e-5, rtol=1e-5)
    print("KERNEL_OK")
</pallas_src>

<mosaic_0001>
module attributes {stable_mosaic.version = 11 : i64} {
  func.func @linear_kernel(%arg0: i32, %arg1: memref<8x10xf32, #tpu.memory_space<vmem>>, %arg2: memref<10x5xf32, #tpu.memory_space<vmem>>, %arg3: memref<1x5xf32, #tpu.memory_space<vmem>>, %arg4: memref<8x5xf32, #tpu.memory_space<vmem>>) attributes {dimension_semantics = [#tpu.dimension_semantics<parallel>], iteration_bounds = array<i64: 1>, scalar_prefetch = 0 : i64, scratch_operands = 0 : i64, tpu.core_type = #tpu.core_type<tc>, window_params = [{transform_indices = @transform_0, window_bounds = array<i64: 8, 10>}, {pipeline_mode = #tpu.pipeline_mode<synchronous>, transform_indices = @transform_1, window_bounds = array<i64: 10, 5>}, {pipeline_mode = #tpu.pipeline_mode<synchronous>, transform_indices = @transform_2, window_bounds = array<i64: 1, 5>}, {transform_indices = @transform_3, window_bounds = array<i64: 8, 5>}]} {
    %c0 = arith.constant 0 : index
    %c0_0 = arith.constant 0 : index
    %0 = vector.load %arg1[%c0, %c0_0] : memref<8x10xf32, #tpu.memory_space<vmem>>, vector<8x10xf32>
    %c0_1 = arith.constant 0 : index
    %c0_2 = arith.constant 0 : index
    %1 = vector.load %arg2[%c0_1, %c0_2] : memref<10x5xf32, #tpu.memory_space<vmem>>, vector<10x5xf32>
    %cst = arith.constant dense<0.000000e+00> : vector<8x5xf32>
    %2 = tpu.matmul %0, %1, %cst {dimension_numbers = #tpu.dot_dimension_numbers<[1], [0], [0], [1], [0, 0, 1, 1], [], []>} : vector<8x10xf32>, vector<10x5xf32>, vector<8x5xf32> -> vector<8x5xf32>
    %c0_3 = arith.constant 0 : index
    %c0_4 = arith.constant 0 : index
    %3 = vector.load %arg3[%c0_3, %c0_4] : memref<1x5xf32, #tpu.memory_space<vmem>>, vector<1x5xf32>
    %4 = vector.broadcast %3 : vector<1x5xf32> to vector<8x5xf32>
    %5 = arith.addf %2, %4 : vector<8x5xf32>
    %c0_5 = arith.constant 0 : index
    %c0_6 = arith.constant 0 : index
    %6 = vector.load %arg4[%c0_5, %c0_6] : memref<8x5xf32, #tpu.memory_space<vmem>>, vector<8x5xf32>
    tpu.vector_store %arg4[%c0_5, %c0_6], %5 {strides = array<i32>} : memref<8x5xf32, #tpu.memory_space<vmem>>, vector<8x5xf32>,
    return
  }
  func.func @transform_0(%arg0: i32) -> (i32, i32) {
    %c0_i32 = arith.constant 0 : i32
    %c0_i32_0 = arith.constant 0 : i32
    return %arg0, %c0_i32 : i32, i32
  }
  func.func @transform_1(%arg0: i32) -> (i32, i32) {
    %c0_i32 = arith.constant 0 : i32
    %c0_i32_0 = arith.constant 0 : i32
    %c0_i32_1 = arith.constant 0 : i32
    return %c0_i32, %c0_i32_0 : i32, i32
  }
  func.func @transform_2(%arg0: i32) -> (i32, i32) {
    %c0_i32 = arith.constant 0 : i32
    %c0_i32_0 = arith.constant 0 : i32
    %c0_i32_1 = arith.constant 0 : i32
    return %c0_i32, %c0_i32_0 : i32, i32
  }
  func.func @transform_3(%arg0: i32) -> (i32, i32) {
    %c0_i32 = arith.constant 0 : i32
    %c0_i32_0 = arith.constant 0 : i32
    return %arg0, %c0_i32 : i32, i32
  }
}

</mosaic_0001>

<bundles_post_ra>
// kernel: linear_forward.1
= control target key start
LH: loop header
LB: loop body
LE: loop exit
PB: predicated region body
PF: predicated region fallthrough
CT: control target
= control target key end

     0   :  { %vm29_vm0 = vcmask 1041408   ;;  %v157_v1 = vmov 0.0   ;;  %vm158_vm1 = vmmov 0   ;;  %s195_s0 = inlined_call_operand.vmem [shape: f32[8,10], index: 0, kind: input, shape index: {}]   ;;  %s196_s1 = inlined_call_operand.vmem [shape: f32[10,5], index: 1, kind: input, shape index: {}]   ;;  %s197_s2 = inlined_call_operand.vmem [shape: f32[1,5], index: 2, kind: input, shape index: {}]   ;;  %s198_s3 = inlined_call_operand.hbm [shape: f32[8,5], index: 3, kind: output, shape index: {}]  }
   0x1   :  { %v17_v0 = vld [vmem:[%s196_s1 + $0x8] sm:$0x3]  ;;  %125 = vmatprep.subr.mxu0 %v157_v1  ;;  %v16_v2 = vld [vmem:[%s196_s1] sm:$0xff]  ;;  %129 = vmatprep.mubr.msk.f32.mxu0 %vm158_vm1, %v157_v1 }
   0x2   :  { %8 = vsyncpa [#allocation3], 0  ;;  %126 = vmatpush3.msk.msra.mxu0 %vm29_vm0, %v17_v0  ;;  %v15_v3 = vld [vmem:[%s195_s0] sm:$0xff]  ;;  %vm25_vm2 = vcmask 80896   ;;  %s159_s20 = smov [#allocation2]   ;;  %vm103_vm3 = vcmask 39936  }
   0x3   :  { %127 = vmatprep.subr.mxu0 %v157_v1  ;;  %v119_v4 = vld [vmem:[%s197_s2] ss:$0 sm:$0xff]  ;;  %s111_s21 = sshll.u32 %s159_s20, 4  ;;  %s112_s21 = int_to_ptr.vmem [resolvable:$true] %s111_s21 }
   0x4   :  { %128 = vmatpush3.msra.mxu0 %v16_v2  ;;  %s135_s1 = scalar_lea.vmem %s112_s21, 128  ;;  %p140_p1 = scmp.lt.s32.totalorder %s112_s21, %s112_s21 }
   0x5   :  { %130 = vmatmul.mubr.msk.f32.vlgmr.msra.gmra.mxu0 %vm25_vm2, %v15_v3  ;;  %p136_p0 = scmp.ne.s32.totalorder %s112_s21, %s135_s1  ;;  %p141_p2 = scmp.lt.s32.totalorder %s135_s1, %s135_s1 }
   0x7   :  { %p142_p3 = por %p141_p2, %p140_p1 }
   0x9   :  { %p143_p4 = pnand %p142_p3, %p136_p0 }
  0xc5   :  { %v99_v5 = vpop.f32.mrf.mxu0 }
  0xc6   :  { %v100_v6 = vadd.f32 %v119_v4, %v99_v5 }
  0xc7   :  { %v131_v7 = vpop.f32.mrf.mxu0 }
  0xc8   :  { %104 = vst.msk [vmem:[#allocation2] sm:$0xff] %vm103_vm3, %v100_v6 }
  0xc9   :  { %146 = shalt.err (!%p143_p4)
}
  0xca   :  { %114 = dma.vmem_to_hbm [thread:$0]  %s112_s21, 128, %s198_s3, [#allocation3]  }
  0xcb   :  { %155 = dma.done.wait [#allocation3], 128  }
  0xcc   :  { %156 = vsyncadd [#allocation3], 4294967168 }
  0xcd   :  { %118 = vsyncpa [#allocation3], 1 }

</bundles_post_ra>
